<compile_context>
chip_gen: v7x
topology: tpu7x:2x2x1
jax: 0.10.0
libtpu: 0.0.40
codegen_flags: <defaults>
</compile_context>

<pallas_src>
import functools

import jax
import jax.numpy as jnp
from jax.experimental import pallas as pl
from jax.experimental.pallas import tpu as pltpu


# ------------------------------ grouped expert FFN kernel ------------------------------
def _moe_grouped_kernel(tile_expert_ref, tile_valid_ref,      # scalar-prefetch (SMEM)
                        x_ref, gate_ref, w1_ref, b1_ref, w2_ref, b2_ref,
                        o_ref, acc_ref):
    del tile_expert_ref                                # only used by the index_maps
    i = pl.program_id(0)
    j = pl.program_id(1)
    last_j = pl.num_programs(1) - 1
    valid = tile_valid_ref[i] != 0                     # SMEM scalar read

    @pl.when(valid)
    def _():
        x = x_ref[...]                                 # (TS, H), model dtype
        w1 = w1_ref[0]                                 # (TF, H)
        b1 = b1_ref[0]                                 # (1, TF)
        w2 = w2_ref[0]                                 # (TF, H)  (pre-transposed proj_w)

        # fc1: contract the shared H dim directly (A·Bᵀ form, no in-kernel transpose).
        h = jax.lax.dot_general(x, w1, (((1,), (1,)), ((), ())),
                                preferred_element_type=jnp.float32) + b1   # (TS, TF) f32
        a = jnp.maximum(h, 0.0).astype(x.dtype)        # relu; bf16 MXU operand for bf16

        # fc2 partial over this F tile: canonical A·B orientation, f32 accumulation.
        part = jax.lax.dot_general(a, w2, (((1,), (0,)), ((), ())),
                                   preferred_element_type=jnp.float32)     # (TS, H)

        @pl.when(j == 0)
        def _():
            acc_ref[...] = part                        # store directly (no zero-init pass)

        @pl.when(j != 0)
        def _():
            acc_ref[...] += part

    @pl.when(jnp.logical_and(j == last_j, valid))
    def _():
        b2 = b2_ref[0]                                 # (1, H)
        g = gate_ref[...]                              # (TS, 1) f32; 0 for padding rows
        o_ref[...] = (g * (acc_ref[...] + b2)).astype(o_ref.dtype)

    @pl.when(jnp.logical_and(j == last_j, jnp.logical_not(valid)))
    def _():
        # Pure-padding tile: compute was skipped, emit zeros (gate would be 0 anyway).
        o_ref[...] = jnp.zeros_like(o_ref)


def _vmem_limit_bytes(tile_s, tile_f, hidden, act_itemsize, w_itemsize):
    """Explicit scoped-VMEM budget: double-buffered blocks + f32 accumulator + margin."""
    blk = (2 * tile_s * hidden * act_itemsize          # x block + out block
           + tile_s * 4                                # gate column (f32)
           + 2 * tile_f * hidden * w_itemsize          # fc1 + fc2 weight blocks
           + tile_f * act_itemsize + hidden * act_itemsize)   # biases
    needed = 2 * blk + tile_s * hidden * 4             # double buffers + f32 acc scratch
    try:
        cap = int(pltpu.get_tpu_info().vmem_capacity_bytes)
    except Exception:                                  # pragma: no cover
        cap = 64 * 1024 * 1024                         # conservative (v7x per-TC)
    return int(min(max(needed + (8 << 20), 32 << 20), cap * 3 // 4))


def moe_grouped_ffn(x_scat, gate_scat, tile_expert, tile_valid,
                    w1, b1, w2t, b2, *, tile_s, tile_f):
    """x_scat: (S_pad, H) expert-grouped token rows; each TILE_S tile belongs to one expert.
    w2t is proj_w pre-transposed to (E, ffn, hidden) for contiguous weight DMAs."""
    s_pad, hidden = x_scat.shape
    num_experts, ffn, _ = w1.shape
    num_tiles = s_pad // tile_s
    num_f = ffn // tile_f

    b1r = b1.reshape(num_experts, 1, ffn)
    b2r = b2.reshape(num_experts, 1, hidden)

    grid_spec = pltpu.PrefetchScalarGridSpec(
        num_scalar_prefetch=2,
        grid=(num_tiles, num_f),
        in_specs=[
            pl.BlockSpec((tile_s, hidden), lambda i, j, te, tv: (i, 0)),          # tokens
            pl.BlockSpec((tile_s, 1), lambda i, j, te, tv: (i, 0)),               # gates
            pl.BlockSpec((1, tile_f, hidden), lambda i, j, te, tv: (te[i], j, 0)),  # fc w
            pl.BlockSpec((1, 1, tile_f), lambda i, j, te, tv: (te[i], 0, j)),       # fc b
            pl.BlockSpec((1, tile_f, hidden), lambda i, j, te, tv: (te[i], j, 0)),  # proj w (T)
            pl.BlockSpec((1, 1, hidden), lambda i, j, te, tv: (te[i], 0, 0)),       # proj b
        ],
        out_specs=pl.BlockSpec((tile_s, hidden), lambda i, j, te, tv: (i, 0)),
        scratch_shapes=[pltpu.VMEM((tile_s, hidden), jnp.float32)],
    )

    vmem_limit = _vmem_limit_bytes(
        tile_s, tile_f, hidden,
        jnp.dtype(x_scat.dtype).itemsize, jnp.dtype(w1.dtype).itemsize)

    return pl.pallas_call(
        _moe_grouped_kernel,
        out_shape=jax.ShapeDtypeStruct((s_pad, hidden), x_scat.dtype),
        grid_spec=grid_spec,
        compiler_params=pltpu.CompilerParams(
            dimension_semantics=("parallel", "arbitrary"),
            vmem_limit_bytes=vmem_limit),
    )(tile_expert, tile_valid, x_scat, gate_scat, w1, b1r, w2t, b2r)


# ------------------------------ full module forward ------------------------------
def mixture_of_experts_forward(hidden_states, params, *, top_k, tile_s=None, tile_f=None):
    """hidden_states: [..., hidden]; returns the same shape/dtype."""
    hidden = hidden_states.shape[-1]
    lead = hidden_states.shape[:-1]
    x = hidden_states.reshape(-1, hidden)            # token-major (T, H)
    num_tokens = x.shape[0]

    router_w = params["router_w"]
    num_experts = router_w.shape[0]
    ffn = params["fc_w"].shape[1]
    num_assign = num_tokens * top_k

    # dtype-aware sublane packing (8 rows f32 / 16 bf16 / 32 int8 per vreg group).
    itemsize = jnp.dtype(hidden_states.dtype).itemsize
    align = {4: 8, 2: 16, 1: 32}.get(itemsize, 8)

    if tile_s is None:
        # ~tokens-per-expert, rounded up to the packing, clamped to [64, 512].
        # 512 keeps the FFN MXU-bound on v6e/v7x and fits v7x's 64 MiB VMEM budget;
        # pass tile_s explicitly (e.g. 1024 on v6e prefill) to go larger.
        target = -(-num_assign // max(num_experts, 1))
        tile_s = int(min(max(((target + align - 1) // align) * align, 64), 512))
    if tile_f is None:
        tile_f = ffn if ffn <= 512 else 512
    assert tile_s % align == 0, f"tile_s must be a multiple of {align} for this dtype"
    assert ffn % tile_f == 0 and (tile_f == ffn or tile_f % 128 == 0)

    # --- router (RowLinear, fp32): tiny, lane-thin output -> keep in XLA ---
    logits = jnp.dot(x.astype(jnp.float32), router_w.T.astype(jnp.float32))   # (T, E)

    # --- RENORMALIZE: top-k over raw logits, softmax over the selected ones ---
    vals, idx = jax.lax.top_k(logits, top_k)                 # (T, k)
    gates = jax.nn.softmax(vals, axis=-1)                    # (T, k) f32

    # --- group the T*k token copies by expert; pad each group to a TILE_S multiple ---
    expert_ids = idx.reshape(-1).astype(jnp.int32)                              # (S,)
    token_ids = jnp.repeat(jnp.arange(num_tokens, dtype=jnp.int32), top_k)      # (S,)
    gate_flat = gates.reshape(-1)

    order = jnp.argsort(expert_ids)
    s_exp = expert_ids[order]
    s_tok = token_ids[order]
    s_gate = gate_flat[order]

    group_sizes = jnp.bincount(expert_ids, length=num_experts).astype(jnp.int32)
    padded_sizes = ((group_sizes + tile_s - 1) // tile_s) * tile_s
    padded_starts = jnp.concatenate(
        [jnp.zeros((1,), jnp.int32), jnp.cumsum(padded_sizes)[:-1].astype(jnp.int32)])
    unpadded_starts = jnp.concatenate(
        [jnp.zeros((1,), jnp.int32), jnp.cumsum(group_sizes)[:-1].astype(jnp.int32)])
    pos_in_group = jnp.arange(num_assign, dtype=jnp.int32) - unpadded_starts[s_exp]
    dest = padded_starts[s_exp] + pos_in_group                                  # (S,)

    # Static upper bound on padded rows: each expert wastes < tile_s rows.
    num_tiles = pl.cdiv(num_assign, tile_s) + num_experts
    s_pad = num_tiles * tile_s

    x_scat = jnp.zeros((s_pad, hidden), x.dtype).at[dest].set(x[s_tok])
    gate_scat = jnp.zeros((s_pad, 1), jnp.float32).at[dest, 0].set(s_gate)
    tok_of_row = jnp.zeros((s_pad,), jnp.int32).at[dest].set(s_tok)

    tiles_per_expert = padded_sizes // tile_s
    tile_ends = jnp.cumsum(tiles_per_expert).astype(jnp.int32)
    tile_expert = jnp.searchsorted(
        tile_ends, jnp.arange(num_tiles, dtype=jnp.int32), side="right")
    tile_expert = jnp.minimum(tile_expert, num_experts - 1).astype(jnp.int32)
    # Tiles past the last real expert tile are pure padding -> compute skipped in-kernel.
    tile_valid = (jnp.arange(num_tiles, dtype=jnp.int32)
                  < tile_ends[-1]).astype(jnp.int32)

    # One-time layout fix (outside the hot kernel): proj_w (E, H, F) -> (E, F, H) so the
    # fc2 weight DMAs read contiguous hidden-length rows and the MXU gets canonical A·B.
    proj_w_t = jnp.swapaxes(params["proj_w"], 1, 2)

    # --- grouped expert FFN (Pallas) ---
    y_scat = moe_grouped_ffn(x_scat, gate_scat, tile_expert, tile_valid,
                             params["fc_w"], params["fc_b"],
                             proj_w_t, params["proj_b"],
                             tile_s=tile_s, tile_f=tile_f)

    # --- scatter-add back to tokens (padding rows carry gate 0 / zeros -> no contribution)
    out = jnp.zeros((num_tokens, hidden), x.dtype).at[tok_of_row].add(y_scat)
    return out.reshape(*lead, hidden)


# ------------------------------ pure-JAX reference ------------------------------
def renormalize_topk_gates(logits, top_k, num_experts):
    vals, idx = jax.lax.top_k(logits, top_k)
    probs = jax.nn.softmax(vals, axis=-1)
    onehot = jax.nn.one_hot(idx, num_experts, dtype=logits.dtype)
    return jnp.sum(onehot * probs[..., None], axis=1)        # (T, E) dense gates


def reference_forward(hidden_states, params, *, top_k):
    hidden = hidden_states.shape[-1]
    lead = hidden_states.shape[:-1]
    x = hidden_states.reshape(-1, hidden)
    logits = x.astype(jnp.float32) @ params["router_w"].T.astype(jnp.float32)
    num_experts = params["router_w"].shape[0]
    gates = renormalize_topk_gates(logits, top_k, num_experts)
    h1 = jnp.einsum("th,efh->tef", x, params["fc_w"]) + params["fc_b"][None]
    a = jnp.maximum(h1, 0.0)
    y = jnp.einsum("tef,ehf->teh", a, params["proj_w"]) + params["proj_b"][None]
    out = jnp.sum(gates[..., None] * y, axis=1).astype(x.dtype)
    return out.reshape(*lead, hidden)


if __name__ == "__main__":
    # Small, shape-consistent config (QuantMode(0), single rank).
    batch, seq = 2, 8
    hidden_size = 128
    ffn_hidden_size = 256
    num_experts = 8
    top_k = 2
    dtype = jnp.float32

    key = jax.random.PRNGKey(0)
    k0, k1, k2, k3, k4, k5 = jax.random.split(key, 6)

    params = {
        # RowLinear(hidden_size, num_experts, bias=False, dtype=fp32): weight (E, H)
        "router_w": jax.random.normal(k0, (num_experts, hidden_size), jnp.float32) * 0.05,
        # MOEWeightWrapper fc: (E, ffn, hidden) + bias (E, ffn)
        "fc_w": jax.random.normal(k1, (num_experts, ffn_hidden_size, hidden_size), dtype) * 0.05,
        "fc_b": jax.random.normal(k2, (num_experts, ffn_hidden_size), dtype) * 0.05,
        # MOEWeightWrapper proj: (E, hidden, ffn) + bias (E, hidden)
        "proj_w": jax.random.normal(k3, (num_experts, hidden_size, ffn_hidden_size), dtype) * 0.05,
        "proj_b": jax.random.normal(k4, (num_experts, hidden_size), dtype) * 0.05,
    }

    hidden_states = jax.random.normal(k5, (batch, seq, hidden_size), dtype)

    fwd = jax.jit(functools.partial(mixture_of_experts_forward, top_k=top_k))
    out = jax.block_until_ready(fwd(hidden_states, params))

    ref = jax.block_until_ready(reference_forward(hidden_states, params, top_k=top_k))
    assert out.shape == hidden_states.shape and out.dtype == dtype
    assert jnp.allclose(out, ref, rtol=1e-4, atol=1e-4), "mismatch vs reference"

    print("KERNEL_OK")
</pallas_src>

<mosaic_0001>
module attributes {stable_mosaic.version = 11 : i64} {
  func.func private @main(%arg0: i32) attributes {dimension_semantics = [#tpu.dimension_semantics<core_parallel>], iteration_bounds = array<i64: 2>, tpu.core_type = #tpu.core_type<sc_scalar_subcore>, window_params = []} {
    return
  }
}

module attributes {stable_mosaic.version = 11 : i64} {
  func.func private @main(%arg0: i32) attributes {dimension_semantics = [#tpu.dimension_semantics<core_parallel>], iteration_bounds = array<i64: 2>, tpu.core_type = #tpu.core_type<sc_scalar_subcore>, window_params = []} {
    return
  }
}

module attributes {stable_mosaic.version = 11 : i64} {
  func.func @_moe_grouped_kernel(%arg0: i32, %arg1: i32, %arg2: memref<9xi32, #tpu.memory_space<smem>>, %arg3: memref<9xi32, #tpu.memory_space<smem>>, %arg4: memref<64x128xf32, #tpu.memory_space<vmem>>, %arg5: memref<64x1xf32, #tpu.memory_space<vmem>>, %arg6: memref<1x256x128xf32, #tpu.memory_space<vmem>>, %arg7: memref<1x1x256xf32, #tpu.memory_space<vmem>>, %arg8: memref<1x256x128xf32, #tpu.memory_space<vmem>>, %arg9: memref<1x1x128xf32, #tpu.memory_space<vmem>>, %arg10: memref<64x128xf32, #tpu.memory_space<vmem>>, %arg11: memref<64x128xf32, #tpu.memory_space<vmem>>) attributes {dimension_semantics = [#tpu.dimension_semantics<parallel>, #tpu.dimension_semantics<arbitrary>], iteration_bounds = array<i64: 9, 1>, scalar_prefetch = 2 : i64, scratch_operands = 1 : i64, tpu.core_type = #tpu.core_type<tc>, window_params = [{transform_indices = @transform_0, window_bounds = array<i64: 64, 128>}, {transform_indices = @transform_1, window_bounds = array<i64: 64, 1>}, {transform_indices = @transform_2, window_bounds = array<i64: 1, 256, 128>}, {transform_indices = @transform_3, window_bounds = array<i64: 1, 1, 256>}, {transform_indices = @transform_4, window_bounds = array<i64: 1, 256, 128>}, {transform_indices = @transform_5, window_bounds = array<i64: 1, 1, 128>}, {transform_indices = @transform_6, window_bounds = array<i64: 64, 128>}]} {
    %0 = arith.index_cast %arg0 : i32 to index
    %1 = memref.load %arg3[%0] : memref<9xi32, #tpu.memory_space<smem>>
    %c0_i32 = arith.constant 0 : i32
    %2 = arith.cmpi ne, %1, %c0_i32 : i32
    %3 = arith.extui %2 : i1 to i32
    %c0_i32_0 = arith.constant 0 : i32
    %4 = arith.cmpi ne, %3, %c0_i32_0 : i32
    scf.if %4 {
      %c0 = arith.constant 0 : index
      %c0_5 = arith.constant 0 : index
      %14 = vector.load %arg4[%c0, %c0_5] : memref<64x128xf32, #tpu.memory_space<vmem>>, vector<64x128xf32>
      %c0_6 = arith.constant 0 : index
      %c0_7 = arith.constant 0 : index
      %c0_8 = arith.constant 0 : index
      %15 = vector.load %arg6[%c0_6, %c0_7, %c0_8] : memref<1x256x128xf32, #tpu.memory_space<vmem>>, vector<1x256x128xf32>
      %16 = vector.shape_cast %15 : vector<1x256x128xf32> to vector<256x128xf32>
      %c0_9 = arith.constant 0 : index
      %c0_10 = arith.constant 0 : index
      %c0_11 = arith.constant 0 : index
      %17 = vector.load %arg7[%c0_9, %c0_10, %c0_11] : memref<1x1x256xf32, #tpu.memory_space<vmem>>, vector<1x1x256xf32>
      %18 = vector.shape_cast %17 : vector<1x1x256xf32> to vector<1x256xf32>
      %c0_12 = arith.constant 0 : index
      %c0_13 = arith.constant 0 : index
      %c0_14 = arith.constant 0 : index
      %19 = vector.load %arg8[%c0_12, %c0_13, %c0_14] : memref<1x256x128xf32, #tpu.memory_space<vmem>>, vector<1x256x128xf32>
      %20 = vector.shape_cast %19 : vector<1x256x128xf32> to vector<256x128xf32>
      %cst = arith.constant dense<0.000000e+00> : vector<64x256xf32>
      %21 = tpu.matmul %14, %16, %cst {dimension_numbers = #tpu.dot_dimension_numbers<[1], [1], [0], [0], [0, 0, 1, 0], [], []>} : vector<64x128xf32>, vector<256x128xf32>, vector<64x256xf32> -> vector<64x256xf32>
      %22 = vector.broadcast %18 : vector<1x256xf32> to vector<64x256xf32>
      %23 = arith.addf %21, %22 : vector<64x256xf32>
      %cst_15 = arith.constant 0.000000e+00 : f32
      %24 = vector.broadcast %cst_15 : f32 to vector<64x256xf32>
      %25 = arith.maximumf %23, %24 : vector<64x256xf32>
      %cst_16 = arith.constant dense<0.000000e+00> : vector<64x128xf32>
      %26 = tpu.matmul %25, %20, %cst_16 {dimension_numbers = #tpu.dot_dimension_numbers<[1], [0], [0], [1], [0, 0, 1, 1], [], []>} : vector<64x256xf32>, vector<256x128xf32>, vector<64x128xf32> -> vector<64x128xf32>
      %c0_i32_17 = arith.constant 0 : i32
      %27 = arith.cmpi eq, %arg1, %c0_i32_17 : i32
      %28 = arith.extui %27 : i1 to i32
      %c0_i32_18 = arith.constant 0 : i32
      %29 = arith.cmpi ne, %28, %c0_i32_18 : i32
      scf.if %29 {
        %c0_21 = arith.constant 0 : index
        %c0_22 = arith.constant 0 : index
        %33 = vector.load %arg11[%c0_21, %c0_22] : memref<64x128xf32, #tpu.memory_space<vmem>>, vector<64x128xf32>
        tpu.vector_store %arg11[%c0_21, %c0_22], %26 {strides = array<i32>} : memref<64x128xf32, #tpu.memory_space<vmem>>, vector<64x128xf32>,
      } else {
      }
      %c0_i32_19 = arith.constant 0 : i32
      %30 = arith.cmpi ne, %arg1, %c0_i32_19 : i32
      %31 = arith.extui %30 : i1 to i32
      %c0_i32_20 = arith.constant 0 : i32
      %32 = arith.cmpi ne, %31, %c0_i32_20 : i32
      scf.if %32 {
        %c0_21 = arith.constant 0 : index
        %c0_22 = arith.constant 0 : index
        %33 = vector.load %arg11[%c0_21, %c0_22] : memref<64x128xf32, #tpu.memory_space<vmem>>, vector<64x128xf32>
        %34 = arith.addf %33, %26 : vector<64x128xf32>
        %c0_23 = arith.constant 0 : index
        %c0_24 = arith.constant 0 : index
        %35 = vector.load %arg11[%c0_23, %c0_24] : memref<64x128xf32, #tpu.memory_space<vmem>>, vector<64x128xf32>
        tpu.vector_store %arg11[%c0_23, %c0_24], %34 {strides = array<i32>} : memref<64x128xf32, #tpu.memory_space<vmem>>, vector<64x128xf32>,
      } else {
      }
    } else {
    }
    %c0_i32_1 = arith.constant 0 : i32
    %5 = arith.cmpi eq, %arg1, %c0_i32_1 : i32
    %6 = arith.andi %5, %2 : i1
    %7 = arith.extui %6 : i1 to i32
    %c0_i32_2 = arith.constant 0 : i32
    %8 = arith.cmpi ne, %7, %c0_i32_2 : i32
    scf.if %8 {
      %c0 = arith.constant 0 : index
      %c0_5 = arith.constant 0 : index
      %c0_6 = arith.constant 0 : index
      %14 = vector.load %arg9[%c0, %c0_5, %c0_6] : memref<1x1x128xf32, #tpu.memory_space<vmem>>, vector<1x1x128xf32>
      %15 = vector.shape_cast %14 : vector<1x1x128xf32> to vector<1x128xf32>
      %c0_7 = arith.constant 0 : index
      %c0_8 = arith.constant 0 : index
      %16 = vector.load %arg5[%c0_7, %c0_8] : memref<64x1xf32, #tpu.memory_space<vmem>>, vector<64x1xf32>
      %c0_9 = arith.constant 0 : index
      %c0_10 = arith.constant 0 : index
      %17 = vector.load %arg11[%c0_9, %c0_10] : memref<64x128xf32, #tpu.memory_space<vmem>>, vector<64x128xf32>
      %18 = vector.broadcast %15 : vector<1x128xf32> to vector<64x128xf32>
      %19 = arith.addf %17, %18 : vector<64x128xf32>
      %20 = vector.broadcast %16 : vector<64x1xf32> to vector<64x128xf32>
      %21 = arith.mulf %20, %19 : vector<64x128xf32>
      %c0_11 = arith.constant 0 : index
      %c0_12 = arith.constant 0 : index
      %22 = vector.load %arg10[%c0_11, %c0_12] : memref<64x128xf32, #tpu.memory_space<vmem>>, vector<64x128xf32>
      tpu.vector_store %arg10[%c0_11, %c0_12], %21 {strides = array<i32>} : memref<64x128xf32, #tpu.memory_space<vmem>>, vector<64x128xf32>,
    } else {
    }
    %c0_i32_3 = arith.constant 0 : i32
    %9 = arith.cmpi eq, %arg1, %c0_i32_3 : i32
    %true = arith.constant true
    %10 = arith.xori %2, %true : i1
    %11 = arith.andi %9, %10 : i1
    %12 = arith.extui %11 : i1 to i32
    %c0_i32_4 = arith.constant 0 : i32
    %13 = arith.cmpi ne, %12, %c0_i32_4 : i32
    scf.if %13 {
      %cst = arith.constant 0.000000e+00 : f32
      %14 = vector.broadcast %cst : f32 to vector<64x128xf32>
      %c0 = arith.constant 0 : index
      %c0_5 = arith.constant 0 : index
      %15 = vector.load %arg10[%c0, %c0_5] : memref<64x128xf32, #tpu.memory_space<vmem>>, vector<64x128xf32>
      tpu.vector_store %arg10[%c0, %c0_5], %14 {strides = array<i32>} : memref<64x128xf32, #tpu.memory_space<vmem>>, vector<64x128xf32>,
    } else {
    }
    return
  }
  func.func @transform_0(%arg0: i32, %arg1: i32, %arg2: memref<9xi32, #tpu.memory_space<smem>>, %arg3: memref<9xi32, #tpu.memory_space<smem>>) -> (i32, i32) {
    %c0_i32 = arith.constant 0 : i32
    %c0_i32_0 = arith.constant 0 : i32
    return %arg0, %c0_i32 : i32, i32
  }
  func.func @transform_1(%arg0: i32, %arg1: i32, %arg2: memref<9xi32, #tpu.memory_space<smem>>, %arg3: memref<9xi32, #tpu.memory_space<smem>>) -> (i32, i32) {
    %c0_i32 = arith.constant 0 : i32
    %c0_i32_0 = arith.constant 0 : i32
    return %arg0, %c0_i32 : i32, i32
  }
  func.func @transform_2(%arg0: i32, %arg1: i32, %arg2: memref<9xi32, #tpu.memory_space<smem>>, %arg3: memref<9xi32, #tpu.memory_space<smem>>) -> (i32, i32, i32) {
    %0 = arith.index_cast %arg0 : i32 to index
    %1 = memref.load %arg2[%0] : memref<9xi32, #tpu.memory_space<smem>>
    %c0_i32 = arith.constant 0 : i32
    %c0_i32_0 = arith.constant 0 : i32
    return %1, %arg1, %c0_i32 : i32, i32, i32
  }
  func.func @transform_3(%arg0: i32, %arg1: i32, %arg2: memref<9xi32, #tpu.memory_space<smem>>, %arg3: memref<9xi32, #tpu.memory_space<smem>>) -> (i32, i32, i32) {
    %0 = arith.index_cast %arg0 : i32 to index
    %1 = memref.load %arg2[%0] : memref<9xi32, #tpu.memory_space<smem>>
    %c0_i32 = arith.constant 0 : i32
    %c0_i32_0 = arith.constant 0 : i32
    return %1, %c0_i32, %arg1 : i32, i32, i32
  }
  func.func @transform_4(%arg0: i32, %arg1: i32, %arg2: memref<9xi32, #tpu.memory_space<smem>>, %arg3: memref<9xi32, #tpu.memory_space<smem>>) -> (i32, i32, i32) {
    %0 = arith.index_cast %arg0 : i32 to index
    %1 = memref.load %arg2[%0] : memref<9xi32, #tpu.memory_space<smem>>
    %c0_i32 = arith.constant 0 : i32
    %c0_i32_0 = arith.constant 0 : i32
    return %1, %arg1, %c0_i32 : i32, i32, i32
  }
  func.func @transform_5(%arg0: i32, %arg1: i32, %arg2: memref<9xi32, #tpu.memory_space<smem>>, %arg3: memref<9xi32, #tpu.memory_space<smem>>) -> (i32, i32, i32) {
    %0 = arith.index_cast %arg0 : i32 to index
    %1 = memref.load %arg2[%0] : memref<9xi32, #tpu.memory_space<smem>>
    %c0_i32 = arith.constant 0 : i32
    %c0_i32_0 = arith.constant 0 : i32
    %c0_i32_1 = arith.constant 0 : i32
    return %1, %c0_i32, %c0_i32_0 : i32, i32, i32
  }
  func.func @transform_6(%arg0: i32, %arg1: i32, %arg2: memref<9xi32, #tpu.memory_space<smem>>, %arg3: memref<9xi32, #tpu.memory_space<smem>>) -> (i32, i32) {
    %c0_i32 = arith.constant 0 : i32
    %c0_i32_0 = arith.constant 0 : i32
    return %arg0, %c0_i32 : i32, i32
  }
}

</mosaic_0001>

<bundles_post_ra>
// kernel: custom-call
= control target key start
LH: loop header
LB: loop body
LE: loop exit
PB: predicated region body
PF: predicated region fallthrough
CT: control target
= control target key end

     0   :  { %s6_s0 = inlined_call_operand.vmem [shape: u32[9], index: 0, kind: output, shape index: {}]  }

// kernel: mixture_of_experts_forward.1
= control target key start
LH: loop header
LB: loop body
LE: loop exit
PB: predicated region body
PF: predicated region fallthrough
CT: control target
= control target key end

     0   :  { %s1561_s0 = inlined_call_operand.vmem [shape: s32[9], index: 0, kind: input, shape index: {}]   ;;  %s1562_s2 = inlined_call_operand.vmem [shape: f32[576,128], index: 2, kind: input, shape index: {}]   ;;  %s1563_s3 = inlined_call_operand.vmem [shape: f32[576,1], index: 3, kind: input, shape index: {}]   ;;  %s1564_s4 = inlined_call_operand.vmem [shape: f32[8,256,128], index: 4, kind: input, shape index: {}]   ;;  %s1565_s5 = inlined_call_operand.vmem [shape: f32[8,1,256], index: 5, kind: input, shape index: {}]   ;;  %s1566_s6 = inlined_call_operand.vmem [shape: f32[8,256,128], index: 6, kind: input, shape index: {}]   ;;  %s1567_s7 = inlined_call_operand.vmem [shape: f32[8,1,128], index: 7, kind: input, shape index: {}]   ;;  %s1568_s8 = inlined_call_operand.vmem [shape: f32[576,128], index: 8, kind: output, shape index: {}]   ;;  %s1569_s1 = inlined_call_operand.vmem [shape: s32[9], index: 1, kind: input, shape index: {}]  }
   0x1   :  { %s13_s29 = sshll.u32 %s1561_s0, 4  ;;  %s17_s10 = sshll.u32 %s1569_s1, 4  ;;  %s14_s29 = int_to_ptr.vmem [resolvable:$true] %s13_s29  ;;  %s18_s10 = int_to_ptr.vmem [resolvable:$true] %s17_s10 }
   0x2   :  { %s1277_s11 = scalar_lea.vmem %s14_s29, 16  ;;  %p1282_p1 = scmp.lt.s32.totalorder %s14_s29, %s14_s29 }
   0x3   :  { %p1278_p0 = scmp.ne.s32.totalorder %s14_s29, %s1277_s11  ;;  %p1283_p2 = scmp.lt.s32.totalorder %s1277_s11, %s1277_s11 }
   0x5   :  { %p1284_p3 = por %p1283_p2, %p1282_p1 }
   0x7   :  { %p1285_p4 = pnand %p1284_p3, %p1278_p0 }
   0x9   :  { %1288 = shalt.err (!%p1285_p4)  }
   0xa   :  { %s1327_s12 = smov [#allocation4]   ;;  %s1289_s13 = scalar_lea.vmem %s18_s10, 16 }
   0xb   :  { %16 = dma.vmem_to_smem %s14_s29, 16, %s1327_s12, [#allocation3] }
   0xc   :  { %p1290_p5 = scmp.ne.s32.totalorder %s18_s10, %s1289_s13  ;;  %p1294_p6 = scmp.lt.s32.totalorder %s18_s10, %s18_s10 }
   0xd   :  { %p1295_p7 = scmp.lt.s32.totalorder %s1289_s13, %s1289_s13 }
   0xf   :  { %p1296_p8 = por %p1295_p7, %p1294_p6 }
  0x11   :  { %p1297_p9 = pnand %p1296_p8, %p1290_p5 }
  0x13   :  { %1300 = shalt.err (!%p1297_p9)  }
  0x14   :  { %s1328_s0 = smov [#allocation5]  }
  0x15   :  { %20 = dma.vmem_to_smem %s18_s10, 16, %s1328_s0, [#allocation3] }
  0x16   :  { %1313 = dma.done.wait [#allocation3], 32 }
  0x17   :  { %1314 = vsyncadd [#allocation3], 4294967264 }
  0x18   :  { %22 = sfence }
  0x19   :  { %s1382_s1 = smov 0   ;;  %s1384_s14 = smov 0  }
  0x1a   :  { %s1386_s15 = smov 0  }
  0x1b LB: > { %s40_s16 = sadd.s32 1, %s1321_s14  ;;  %p1057_p10 = scmp.ge.s32.totalorder %s1325_s15, 1  ;;  %s1325_s15 = sphi %s1386_s15, %s28_s15   ;;  %s1321_s14 = sphi %s1384_s14, %s1571_s14   ;;  %s1317_s1 = sphi %s1382_s1, %s1570_s1  }
  0x1c   : > { %p42_p11 = scmp.ge.s32.totalorder %s40_s16, 9  ;;  %p322_p12 = scmp.lt.s32.totalorder %s1325_s15, 10 }
  0x1e   : > { %s1573_s16 = smov (%p42_p11, %s40_s16), 0  ;;  %p323_p13 = pnand %p1057_p10, %p322_p12 }
  0x1f   : > { %s1058_s17 = sshll.u32 (!%p323_p13), %s1317_s1, 3  ;;  %s402_s18 = sld [smem:[#allocation4 + %s1317_s1]] (!%p323_p13) }
  0x20   : > { %326 = sbr.rel (%p323_p13) target bundleno = 731 (0x2db), region = 44  ;;  %p391_p0 = scmp.lt.s32.totalorder (!%p323_p13), %s1058_s17, 71 }
  0x21   : > { %s414_s19 = sld [smem:[#allocation4 + %s1317_s1]] (!%p323_p13) }
  0x22   : > { %s425_s20 = sld [smem:[#allocation4 + %s1317_s1]] (!%p323_p13) }
  0x23   : > { %s437_s21 = sld [smem:[#allocation4 + %s1317_s1]] (!%p323_p13) }
  0x24   : > { %s1400_s23 = sld [smem:[#allocation5 + %s1317_s1]] (!%p323_p13) }
  0x25   : > { %p404_p1 = scmp.lt.s32.totalorder (!%p323_p13), %s402_s18, 7 }
  0x27   : > { %s1575_s17 = smov (!%p391_p0, %s1058_s17), 71  ;;  %p416_p2 = scmp.lt.s32.totalorder %s414_s19, 7 }
  0x28   : > { %s1059_s22 = sshll.u32 %s1575_s17, 3  ;;  %p427_p3 = scmp.lt.s32.totalorder %s425_s20, 7 }
  0x29   : > { %s1405_s26 = scalar_lea.vmem %s1562_s2, %s1059_s22  ;;  %s1410_s29 = scalar_lea.vmem %s1563_s3, %s1059_s22 }
  0x2a   : > { %p438_p4 = scmp.lt.s32.totalorder %s437_s21, 7  ;;  %s1577_s18 = smov (!%p404_p1, %s402_s18), 7 }
  0x2b   : > { %s1579_s19 = smov (!%p416_p2, %s414_s19), 7  ;;  %s1075_s30 = sshll.u32 %s1577_s18, 8 }
  0x2c   : > { %s1415_s11 = scalar_lea.vmem %s1568_s8, %s1059_s22  ;;  %s1420_s0 = scalar_lea.vmem %s1564_s4, %s1075_s30 }
  0x2d   : > { %s1064_s1 = sshll.u32 %s1579_s19, 1  ;;  %p449_p5 = scmp.ne.s32.totalorder %s1400_s23, 0 }
  0x2e   : > { %s1425_s25 = scalar_lea.vmem %s1565_s5, %s1064_s1  ;;  %s1581_s20 = smov (!%p427_p3, %s425_s20), 7 }
  0x2f   : > { %s1583_s21 = smov (!%p438_p4, %s437_s21), 7  ;;  %s1076_s18 = sshll.u32 %s1581_s20, 8 }
  0x30   : > { %s1433_s28 = scalar_lea.vmem %s1566_s6, %s1076_s18  ;;  %s440_s19 = scalar_lea.vmem %s1567_s7, %s1583_s21 }
  0x31   : > { %p1069_p6 = scmp.eq.s32.totalorder %s1400_s23, 0 }
  0x32   : > { %v477_v0 = vld [vmem:[%s1420_s0 + $0x80] sm:$0xff] (!%p1069_p6)  ;;  %v478_v1 = vld [vmem:[%s1420_s0 + $0x88] sm:$0xff] (!%p1069_p6)  ;;  %v479_v5 = vld [vmem:[%s1420_s0 + $0x90] sm:$0xff] (!%p1069_p6) }
  0x33   : > { %452 = sbr.rel (%p1069_p6) target bundleno = 579 (0x243), region = 48  ;;  %v461_v2 = vld [vmem:[%s1420_s0] sm:$0xff] (!%p1069_p6)  ;;  %v1183_v3 = vpack.c.bf16 (!%p1069_p6), %v478_v1, %v477_v0  ;;  %v462_v4 = vld [vmem:[%s1420_s0 + $0x8] sm:$0xff] (!%p1069_p6)  ;;  %v480_v6 = vld [vmem:[%s1420_s0 + $0x98] sm:$0xff] (!%p1069_p6) }
  0x34   : > { %v1185_v7 = vpack.c.bf16 (!%p1069_p6), %v462_v4, %v461_v2  ;;  %v1187_v8 = vpack.c.bf16 (!%p1069_p6), %v480_v6, %v479_v5  ;;  %v463_v9 = vld [vmem:[%s1420_s0 + $0x10] sm:$0xff] (!%p1069_p6)  ;;  %v464_v10 = vld [vmem:[%s1420_s0 + $0x18] sm:$0xff] (!%p1069_p6)  ;;  %v481_v11 = vld [vmem:[%s1420_s0 + $0xa0] sm:$0xff] (!%p1069_p6) }
  0x35   : > { %1184 = vmatprep.subr.bf16.mxu0 (!%p1069_p6), %v1183_v3  ;;  %v482_v12 = vld [vmem:[%s1420_s0 + $0xa8] sm:$0xff] (!%p1069_p6)  ;;  %v1189_v13 = vpack.c.bf16 (!%p1069_p6), %v464_v10, %v463_v9  ;;  %v1453_v15 = vld [vmem:[%s1405_s26] sm:$0xff] (!%p1069_p6)  ;;  %v483_v18 = vld [vmem:[%s1420_s0 + $0xb0] sm:$0xff] (!%p1069_p6) }
  0x36   : > { %1186 = vmatpush3.bf16.xpose.msra.mxu0 (!%p1069_p6), %v1185_v7  ;;  %v1191_v14 = vpack.c.bf16 (!%p1069_p6), %v482_v12, %v481_v11  ;;  %1111 = vmatprep.mubr.f32.mxu0 (!%p1069_p6), %v1453_v15  ;;  %v465_v16 = vld [vmem:[%s1420_s0 + $0x20] sm:$0xff] (!%p1069_p6)  ;;  %v466_v17 = vld [vmem:[%s1420_s0 + $0x28] sm:$0xff] (!%p1069_p6)  ;;  %v484_v19 = vld [vmem:[%s1420_s0 + $0xb8] sm:$0xff] (!%p1069_p6) }
  0x37   : > { %1188 = vmatprep.subr.bf16.mxu0 (!%p1069_p6), %v1187_v8  ;;  %v510_v20 = vld [vmem:[%s1433_s28 + $0x80] sm:$0xff] (!%p1069_p6)  ;;  %v511_v21 = vld [vmem:[%s1433_s28 + $0x88] sm:$0xff] (!%p1069_p6)  ;;  %v512_v25 = vld [vmem:[%s1433_s28 + $0x90] sm:$0xff] (!%p1069_p6)  ;;  %v1193_v30 = vpack.c.bf16 (!%p1069_p6), %v466_v17, %v465_v16  ;;  %v1195_v34 = vpack.c.bf16 (!%p1069_p6), %v484_v19, %v483_v18 }
  0x38   : > { %v1215_v22 = vpack.c.bf16 (!%p1069_p6), %v511_v21, %v510_v20  ;;  %v494_v23 = vld [vmem:[%s1433_s28] sm:$0xff] (!%p1069_p6)  ;;  %v495_v24 = vld [vmem:[%s1433_s28 + $0x8] sm:$0xff] (!%p1069_p6)  ;;  %v513_v27 = vld [vmem:[%s1433_s28 + $0x98] sm:$0xff] (!%p1069_p6) }
  0x39   : > { %v1217_v26 = vpack.c.bf16 (!%p1069_p6), %v495_v24, %v494_v23  ;;  %v496_v28 = vld [vmem:[%s1433_s28 + $0x10] sm:$0xff] (!%p1069_p6)  ;;  %v497_v29 = vld [vmem:[%s1433_s28 + $0x18] sm:$0xff] (!%p1069_p6)  ;;  %v1219_v31 = vpack.c.bf16 (!%p1069_p6), %v513_v27, %v512_v25  ;;  %v514_v32 = vld [vmem:[%s1433_s28 + $0xa0] sm:$0xff] (!%p1069_p6) }
  0x3a   : > { %1216 = vmatprep.subr.bf16.mxu1 %v1215_v22  ;;  %v515_v33 = vld [vmem:[%s1433_s28 + $0xa8] sm:$0xff]  ;;  %v1221_v35 = vpack.c.bf16 %v497_v29, %v496_v28  ;;  %v498_v37 = vld [vmem:[%s1433_s28 + $0x20] sm:$0xff]  ;;  %v516_v39 = vld [vmem:[%s1433_s28 + $0xb0] sm:$0xff] }
  0x3b   : > { %1218 = vmatpush3.bf16.msra.mxu1 %v1217_v26  ;;  %v1223_v36 = vpack.c.bf16 %v515_v33, %v514_v32  ;;  %v499_v38 = vld [vmem:[%s1433_s28 + $0x28] sm:$0xff]  ;;  %v517_v40 = vld [vmem:[%s1433_s28 + $0xb8] sm:$0xff]  ;;  %v467_v41 = vld [vmem:[%s1420_s0 + $0x30] sm:$0xff] }
  0x3c   : > { %1220 = vmatprep.subr.bf16.mxu1 %v1219_v31  ;;  %v468_v42 = vld [vmem:[%s1420_s0 + $0x38] sm:$0xff]  ;;  %v485_v43 = vld [vmem:[%s1420_s0 + $0xc0] sm:$0xff]  ;;  %v1225_v44 = vpack.c.bf16 %v499_v38, %v498_v37  ;;  %v486_v45 = vld [vmem:[%s1420_s0 + $0xc8] sm:$0xff]  ;;  %v1227_v46 = vpack.c.bf16 %v517_v40, %v516_v39  ;;  %v527_v40 = vlaneseq }
  0x3d   : > { %v500_v47 = vld [vmem:[%s1433_s28 + $0x30] sm:$0xff]  ;;  %v501_v48 = vld [vmem:[%s1433_s28 + $0x38] sm:$0xff]  ;;  %v518_v49 = vld [vmem:[%s1433_s28 + $0xc0] sm:$0xff]  ;;  %v1197_v51 = vpack.c.bf16 %v468_v42, %v467_v41  ;;  %v1199_v52 = vpack.c.bf16 %v486_v45, %v485_v43 }
  0x3e   : > { %1190 = vmatpush3.bf16.xpose.msra.mxu0 %v1189_v13  ;;  %v519_v50 = vld [vmem:[%s1433_s28 + $0xc8] sm:$0xff]  ;;  %v1229_v53 = vpack.c.bf16 %v501_v48, %v500_v47  ;;  %v502_v55 = vld [vmem:[%s1433_s28 + $0x40] sm:$0xff]  ;;  %v520_v57 = vld [vmem:[%s1433_s28 + $0xd0] sm:$0xff]  ;;  %v528_v41 = vshrl.u32 %v527_v40, 7 }
  0x3f   : > { %1192 = vmatprep.subr.bf16.mxu0 %v1191_v14  ;;  %1222 = vmatpush3.bf16.msra.mxu1 %v1221_v35  ;;  %v1231_v54 = vpack.c.bf16 %v519_v50, %v518_v49  ;;  %v503_v56 = vld [vmem:[%s1433_s28 + $0x48] sm:$0xff]  ;;  %v521_v58 = vld [vmem:[%s1433_s28 + $0xd8] sm:$0xff]  ;;  %v469_v59 = vld [vmem:[%s1420_s0 + $0x40] sm:$0xff] }
  0x40   : > { %1224 = vmatprep.subr.bf16.mxu1 %v1223_v36  ;;  %v470_v60 = vld [vmem:[%s1420_s0 + $0x48] sm:$0xff]  ;;  %v487_v61 = vld [vmem:[%s1420_s0 + $0xd0] sm:$0xff]  ;;  %v1233_v62 = vpack.c.bf16 %v503_v56, %v502_v55  ;;  %v488_v63 = vld [vmem:[%s1420_s0 + $0xd8] sm:$0xff]  ;;  %v1235_v0 = vpack.c.bf16 %v521_v58, %v520_v57  ;;  %v529_v42 = vsub.s32 0, %v528_v41 }
  0x41   : > { %v504_v1 = vld [vmem:[%s1433_s28 + $0x50] sm:$0xff]  ;;  %v505_v2 = vld [vmem:[%s1433_s28 + $0x58] sm:$0xff]  ;;  %v522_v3 = vld [vmem:[%s1433_s28 + $0xe0] sm:$0xff]  ;;  %v1201_v5 = vpack.c.bf16 %v470_v60, %v469_v59  ;;  %v1203_v6 = vpack.c.bf16 %v488_v63, %v487_v61 }
  0x42   : > { %v523_v4 = vld [vmem:[%s1433_s28 + $0xe8] sm:$0xff]  ;;  %v1237_v7 = vpack.c.bf16 %v505_v2, %v504_v1  ;;  %v471_v9 = vld [vmem:[%s1420_s0 + $0x50] sm:$0xff]  ;;  %v472_v10 = vld [vmem:[%s1420_s0 + $0x58] sm:$0xff] }
  0x43   : > { %1226 = vmatpush3.bf16.msra.mxu1 %v1225_v44  ;;  %v1239_v8 = vpack.c.bf16 %v523_v4, %v522_v3  ;;  %v489_v11 = vld [vmem:[%s1420_s0 + $0xe0] sm:$0xff]  ;;  %v490_v12 = vld [vmem:[%s1420_s0 + $0xe8] sm:$0xff]  ;;  %v1205_v13 = vpack.c.bf16 %v472_v10, %v471_v9  ;;  %v491_v18 = vld [vmem:[%s1420_s0 + $0xf0] sm:$0xff]  ;;  %v533_v44 = vsub.s32 1, %v528_v41 }
  0x44   : > { %1228 = vmatprep.subr.bf16.mxu1 %v1227_v46  ;;  %v1207_v14 = vpack.c.bf16 %v490_v12, %v489_v11  ;;  %v473_v16 = vld [vmem:[%s1420_s0 + $0x60] sm:$0xff]  ;;  %v474_v17 = vld [vmem:[%s1420_s0 + $0x68] sm:$0xff]  ;;  %v492_v19 = vld [vmem:[%s1420_s0 + $0xf8] sm:$0xff] }
  0x45   : > { %v1209_v20 = vpack.c.bf16 %v474_v17, %v473_v16  ;;  %v1211_v21 = vpack.c.bf16 %v492_v19, %v491_v18  ;;  %v475_v22 = vld [vmem:[%s1420_s0 + $0x70] sm:$0xff]  ;;  %v476_v23 = vld [vmem:[%s1420_s0 + $0x78] sm:$0xff]  ;;  %v454_v25 = vld [vmem:[%s1405_s26 + $0x8] sm:$0xff] }
  0x46   : > { %1194 = vmatpush3.bf16.xpose.msra.mxu0 %v1193_v30  ;;  %v1213_v24 = vpack.c.bf16 %v476_v23, %v475_v22  ;;  %v455_v26 = vld [vmem:[%s1405_s26 + $0x10] sm:$0xff]  ;;  %v456_v27 = vld [vmem:[%s1405_s26 + $0x18] sm:$0xff]  ;;  %v457_v28 = vld [vmem:[%s1405_s26 + $0x20] sm:$0xff] }
  0x47   : > { %1196 = vmatprep.subr.bf16.mxu0 %v1195_v34  ;;  %1230 = vmatpush3.bf16.msra.mxu1 %v1229_v53  ;;  %v458_v29 = vld [vmem:[%s1405_s26 + $0x28] sm:$0xff]  ;;  %v460_v30 = vld [vmem:[%s1405_s26 + $0x38] sm:$0xff]  ;;  %v506_v31 = vld [vmem:[%s1433_s28 + $0x60] sm:$0xff] }
  0x48   : > { %1232 = vmatprep.subr.bf16.mxu1 %v1231_v54  ;;  %v507_v32 = vld [vmem:[%s1433_s28 + $0x68] sm:$0xff]  ;;  %v524_v34 = vld [vmem:[%s1433_s28 + $0xf0] sm:$0xff]  ;;  %v525_v35 = vld [vmem:[%s1433_s28 + $0xf8] sm:$0xff] }
  0x49   : > { %v1241_v33 = vpack.c.bf16 %v507_v32, %v506_v31  ;;  %v1243_v36 = vpack.c.bf16 %v525_v35, %v524_v34  ;;  %v508_v37 = vld [vmem:[%s1433_s28 + $0x70] sm:$0xff]  ;;  %v509_v38 = vld [vmem:[%s1433_s28 + $0x78] sm:$0xff]  ;;  %v493_v43 = vld [vmem:[%s1425_s25] sm:$0x3] }
  0x4a   : > { %v1245_v39 = vpack.c.bf16 %v509_v38, %v508_v37  ;;  %v530_v45 = vrot.slane %v493_v43, %v529_v42  ;;  %v534_v46 = vrot.slane %v493_v43, %v533_v44 }
  0x4b   : > { %1234 = vmatpush3.bf16.msra.mxu1 %v1233_v62 }
  0x4c   : > { %1236 = vmatprep.subr.bf16.mxu1 %v1235_v0 }
  0x4e   : > { %1198 = vmatpush3.bf16.xpose.msra.mxu0 %v1197_v51 }
  0x4f   : > { %1200 = vmatprep.subr.bf16.mxu0 %v1199_v52  ;;  %1238 = vmatpush3.bf16.msra.mxu1 %v1237_v7 }
  0x50   : > { %1240 = vmatprep.subr.bf16.mxu1 %v1239_v8 }
  0x53   : > { %1242 = vmatpush3.bf16.msra.mxu1 %v1241_v33 }
  0x54   : > { %1244 = vmatprep.subr.bf16.mxu1 %v1243_v36 }
  0x56   : > { %1202 = vmatpush3.bf16.xpose.msra.mxu0 %v1201_v5 }
  0x57   : > { %1204 = vmatprep.subr.bf16.mxu0 %v1203_v6  ;;  %1246 = vmatpush3.bf16.msra.mxu1 %v1245_v39 }
  0x5e   : > { %1206 = vmatpush3.bf16.xpose.msra.mxu0 %v1205_v13 }
  0x5f   : > { %1208 = vmatprep.subr.bf16.mxu0 %v1207_v14 }
  0x66   : > { %1210 = vmatpush3.bf16.xpose.msra.mxu0 %v1209_v20 }
  0x67   : > { %1212 = vmatprep.subr.bf16.mxu0 %v1211_v21 }
  0x6e   : > { %1214 = vmatpush3.bf16.xpose.msra.mxu0 %v1213_v24 }
  0x75   : > { %1112 = vmatmul.mubr.f32.vlgmr.msra.gmra.mrb[0].mxu0 %v1453_v15  ;;  %v459_v15 = vld [vmem:[%s1405_s26 + $0x30] sm:$0xff] }
  0x76   : > { %1113 = vmatprep.mubr.f32.mxu0 %v454_v25 }
  0x79   : > { %1114 = vmatmul.mubr.f32.gmra.mrb[2].mxu0 %v454_v25 }
  0x7a   : > { %1115 = vmatprep.mubr.f32.mxu0 %v455_v26 }
  0x7d   : > { %1116 = vmatmul.mubr.f32.gmra.mrb[4].mxu0 %v455_v26 }
  0x7e   : > { %1117 = vmatprep.mubr.f32.mxu0 %v456_v27 }
  0x81   : > { %1118 = vmatmul.mubr.f32.gmra.mrb[6].mxu0 %v456_v27 }
  0x82   : > { %1119 = vmatprep.mubr.f32.mxu0 %v457_v28 }
  0x85   : > { %1120 = vmatmul.mubr.f32.gmra.mrb[8].mxu0 %v457_v28 }
  0x86   : > { %1121 = vmatprep.mubr.f32.mxu0 %v458_v29 }
  0x89   : > { %1122 = vmatmul.mubr.f32.gmra.mrb[10].mxu0 %v458_v29 }
  0x8a   : > { %1123 = vmatprep.mubr.f32.mxu0 %v459_v15 }
  0x8d   : > { %1124 = vmatmul.mubr.f32.gmra.mrb[12].mxu0 %v459_v15 }
  0x8e   : > { %1125 = vmatprep.mubr.f32.mxu0 %v460_v30 }
  0x91   : > { %1126 = vmatmul.mubr.f32.gmra.mrb[14].mxu0 %v460_v30 }
 0x148   : > { %v603_v47 = vpop.f32.mrb[0].mxu0 }
 0x149   : > { %v604_v48 = vadd.f32 %v603_v47, %v530_v45  ;;  %v605_v49 = vpop.f32.mrb[1].mxu0 }
 0x14a   : > { %v606_v50 = vadd.f32 %v605_v49, %v534_v46 }
 0x14b   : > { %v650_v53 = vmax.f32 %v604_v48, 0.0 }
 0x14c   : > { %v609_v51 = vpop.f32.mrb[2].mxu0  ;;  %v651_v52 = vmax.f32 %v606_v50, 0.0 }
 0x14d   : > { %v610_v54 = vadd.f32 %v609_v51, %v530_v45  ;;  %v611_v55 = vpop.f32.mrb[3].mxu0 }
 0x14e   : > { %v612_v56 = vadd.f32 %v611_v55, %v534_v46  ;;  %730 = vmatprep.mubr.f32.mxu1 %v651_v52 }
 0x14f   : > { %731 = vmatmul.mubr.f32.vlgmr.msra.gmra.mrb[0].mxu1 %v650_v53  ;;  %v652_v59 = vmax.f32 %v610_v54, 0.0 }
 0x150   : > { %v653_v57 = vmax.f32 %v612_v56, 0.0  ;;  %v615_v58 = vpop.f32.mrb[4].mxu0 }
 0x151   : > { %v616_v60 = vadd.f32 %v615_v58, %v530_v45  ;;  %v617_v61 = vpop.f32.mrb[5].mxu0 }
 0x152   : > { %v618_v62 = vadd.f32 %v617_v61, %v534_v46  ;;  %735 = vmatprep.mubr.f32.mxu1 %v653_v57 }
 0x153   : > { %736 = vmatmul.mubr.f32.gmra.mrb[2].mxu1 %v652_v59  ;;  %v654_v1 = vmax.f32 %v616_v60, 0.0 }
 0x154   : > { %v655_v63 = vmax.f32 %v618_v62, 0.0  ;;  %v621_v0 = vpop.f32.mrb[6].mxu0 }
 0x155   : > { %v622_v2 = vadd.f32 %v621_v0, %v530_v45  ;;  %v623_v3 = vpop.f32.mrb[7].mxu0 }
 0x156   : > { %v624_v4 = vadd.f32 %v623_v3, %v534_v46  ;;  %740 = vmatprep.mubr.f32.mxu1 %v655_v63 }
 0x157   : > { %741 = vmatmul.mubr.f32.gmra.mrb[4].mxu1 %v654_v1  ;;  %v656_v7 = vmax.f32 %v622_v2, 0.0 }
 0x158   : > { %v657_v5 = vmax.f32 %v624_v4, 0.0  ;;  %v627_v6 = vpop.f32.mrb[8].mxu0 }
 0x159   : > { %v628_v8 = vadd.f32 %v627_v6, %v530_v45  ;;  %v629_v9 = vpop.f32.mrb[9].mxu0 }
 0x15a   : > { %v630_v10 = vadd.f32 %v629_v9, %v534_v46  ;;  %745 = vmatprep.mubr.f32.mxu1 %v657_v5 }
 0x15b   : > { %746 = vmatmul.mubr.f32.gmra.mrb[6].mxu1 %v656_v7  ;;  %v658_v13 = vmax.f32 %v628_v8, 0.0 }
 0x15c   : > { %v659_v11 = vmax.f32 %v630_v10, 0.0  ;;  %v633_v12 = vpop.f32.mrb[10].mxu0 }
 0x15d   : > { %v634_v14 = vadd.f32 %v633_v12, %v530_v45  ;;  %v635_v16 = vpop.f32.mrb[11].mxu0 }
 0x15e   : > { %v636_v17 = vadd.f32 %v635_v16, %v534_v46  ;;  %750 = vmatprep.mubr.f32.mxu1 %v659_v11 }
 0x15f   : > { %751 = vmatmul.mubr.f32.gmra.mrb[8].mxu1 %v658_v13  ;;  %v660_v20 = vmax.f32 %v634_v14, 0.0 }
 0x160   : > { %v661_v18 = vmax.f32 %v636_v17, 0.0  ;;  %v639_v19 = vpop.f32.mrb[12].mxu0 }
 0x161   : > { %v640_v21 = vadd.f32 %v639_v19, %v530_v45  ;;  %v641_v22 = vpop.f32.mrb[13].mxu0 }
 0x162   : > { %v642_v23 = vadd.f32 %v641_v22, %v534_v46  ;;  %755 = vmatprep.mubr.f32.mxu1 %v661_v18 }
 0x163   : > { %756 = vmatmul.mubr.f32.gmra.mrb[10].mxu1 %v660_v20  ;;  %v662_v26 = vmax.f32 %v640_v21, 0.0 }
 0x164   : > { %v663_v24 = vmax.f32 %v642_v23, 0.0  ;;  %v645_v25 = vpop.f32.mrb[14].mxu0 }
 0x165   : > { %v646_v27 = vadd.f32 %v645_v25, %v530_v45  ;;  %v647_v28 = vpop.f32.mrb[15].mxu0 }
 0x166   : > { %v648_v29 = vadd.f32 %v647_v28, %v534_v46  ;;  %760 = vmatprep.mubr.f32.mxu1 %v663_v24 }
 0x167   : > { %761 = vmatmul.mubr.f32.gmra.mrb[12].mxu1 %v662_v26  ;;  %v664_v30 = vmax.f32 %v646_v27, 0.0 }
 0x168   : > { %v665_v15 = vmax.f32 %v648_v29, 0.0 }
 0x16a   : > { %765 = vmatprep.mubr.f32.mxu1 %v665_v15 }
 0x16b   : > { %766 = vmatmul.mubr.f32.gmra.mrb[14].mxu1 %v664_v30 }
 0x222   : > { %v1159_v31 = vpop.f32.mrb[0].mxu1 }
 0x223   : > { %v1160_v32 = vpop.f32.mrb[1].mxu1 }
 0x224   : > { %v1161_v33 = vadd.f32 %v1160_v32, %v1159_v31 }
 0x226   : > { %775 = vst [vmem:[#allocation2] sm:$0xff] %v1161_v33  ;;  %v1162_v34 = vpop.f32.mrb[2].mxu1 }
 0x227   : > { %v1163_v35 = vpop.f32.mrb[3].mxu1 }
 0x228   : > { %v1164_v36 = vadd.f32 %v1163_v35, %v1162_v34 }
 0x22a   : > { %776 = vst [vmem:[#allocation2 + $0x8] sm:$0xff] %v1164_v36  ;;  %v1165_v37 = vpop.f32.mrb[4].mxu1 }
 0x22b   : > { %v1166_v38 = vpop.f32.mrb[5].mxu1 }
 0x22c   : > { %v1167_v39 = vadd.f32 %v1166_v38, %v1165_v37 }
 0x22e   : > { %777 = vst [vmem:[#allocation2 + $0x10] sm:$0xff] %v1167_v39  ;;  %v1168_v40 = vpop.f32.mrb[6].mxu1 }
 0x22f   : > { %v1169_v41 = vpop.f32.mrb[7].mxu1 }
 0x230   : > { %v1170_v42 = vadd.f32 %v1169_v41, %v1168_v40 }
 0x232   : > { %778 = vst [vmem:[#allocation2 + $0x18] sm:$0xff] %v1170_v42  ;;  %v1171_v43 = vpop.f32.mrb[8].mxu1 }
 0x233   : > { %v1172_v44 = vpop.f32.mrb[9].mxu1 }
 0x234   : > { %v1173_v45 = vadd.f32 %v1172_v44, %v1171_v43 }
 0x236   : > { %779 = vst [vmem:[#allocation2 + $0x20] sm:$0xff] %v1173_v45  ;;  %v1174_v46 = vpop.f32.mrb[10].mxu1 }
 0x237   : > { %v1175_v47 = vpop.f32.mrb[11].mxu1 }
 0x238   : > { %v1176_v48 = vadd.f32 %v1175_v47, %v1174_v46 }
 0x23a   : > { %780 = vst [vmem:[#allocation2 + $0x28] sm:$0xff] %v1176_v48  ;;  %v1177_v49 = vpop.f32.mrb[12].mxu1 }
 0x23b   : > { %v1178_v50 = vpop.f32.mrb[13].mxu1 }
 0x23c   : > { %v1179_v51 = vadd.f32 %v1178_v50, %v1177_v49 }
 0x23e   : > { %781 = vst [vmem:[#allocation2 + $0x30] sm:$0xff] %v1179_v51  ;;  %v1180_v52 = vpop.f32.mrb[14].mxu1 }
 0x23f   : > { %v1181_v53 = vpop.f32.mrb[15].mxu1 }
 0x240   : > { %v1182_v54 = vadd.f32 %v1181_v53, %v1180_v52 }
 0x242   : > { %782 = vst [vmem:[#allocation2 + $0x38] sm:$0xff] %v1182_v54 }
 0x243 PF: > { %815 = sbr.rel (!%p449_p5) target bundleno = 724 (0x2d4), region = 60  ;;  %v819_v55 = vld [vmem:[%s1410_s29 + $0x10] sm:$0xff] (%p449_p5)  ;;  %v817_v56 = vld [vmem:[%s1410_s29] sm:$0xff] (%p449_p5)  ;;  %v1329_v57 = vmov (%p449_p5), 0   ;;  %v820_v58 = vld [vmem:[%s1410_s29 + $0x18] sm:$0xff] (%p449_p5) }
 0x244   : > { %1276 = vset.pattern.permute.xlu1 (%p449_p5), %v1329_v57  ;;  %1275 = vset.pattern.permute.xlu0 (%p449_p5), %v1329_v57  ;;  %v818_v59 = vld [vmem:[%s1410_s29 + $0x8] sm:$0xff] (%p449_p5)  ;;  %v821_v61 = vld [vmem:[%s1410_s29 + $0x20] sm:$0xff] (%p449_p5)  ;;  %v824_v62 = vld [vmem:[%s1410_s29 + $0x38] sm:$0xff] (%p449_p5) }
 0x245   : > { %859 = vperm.xlu1 (%p449_p5), %1276, %v819_v55   ;;  %849 = vperm.xlu0 (%p449_p5), %1275, %v817_v56   ;;  %v822_v60 = vld [vmem:[%s1410_s29 + $0x28] sm:$0xff] (%p449_p5)  ;;  %v823_v63 = vld [vmem:[%s1410_s29 + $0x30] sm:$0xff] (%p449_p5)  ;;  %v827_v0 = vld [vmem:[#allocation2 + $0x10] sm:$0xff] (%p449_p5) }
 0x246   : > { %v1071_v1 = vld [vmem:[%s440_s19] ss:$0 sm:$0xff] (%p449_p5)  ;;  %v825_v2 = vld [vmem:[#allocation2] sm:$0xff] (%p449_p5)  ;;  %v828_v5 = vld [vmem:[#allocation2 + $0x18] sm:$0xff] (%p449_p5) }
 0x247   : > { %v841_v3 = vadd.f32 (%p449_p5), %v1071_v1, %v827_v0  ;;  %v839_v4 = vadd.f32 (%p449_p5), %v1071_v1, %v825_v2  ;;  %v826_v6 = vld [vmem:[#allocation2 + $0x8] sm:$0xff] (%p449_p5)  ;;  %v842_v11 = vadd.f32 (%p449_p5), %v1071_v1, %v828_v5  ;;  %v829_v14 = vld [vmem:[#allocation2 + $0x20] sm:$0xff] (%p449_p5)  ;;  %v831_v23 = vld [vmem:[#allocation2 + $0x30] sm:$0xff] (%p449_p5) }
 0x248   : > { %v840_v12 = vadd.f32 (%p449_p5), %v1071_v1, %v826_v6  ;;  %v830_v13 = vld [vmem:[#allocation2 + $0x28] sm:$0xff] (%p449_p5)  ;;  %v843_v21 = vadd.f32 (%p449_p5), %v1071_v1, %v829_v14  ;;  %v845_v29 = vadd.f32 (%p449_p5), %v1071_v1, %v831_v23 }
 0x249   : > { %864 = vperm.xlu1 (%p449_p5), %1276, %v820_v58   ;;  %854 = vperm.xlu0 (%p449_p5), %1275, %v818_v59   ;;  %v844_v20 = vadd.f32 (%p449_p5), %v1071_v1, %v830_v13  ;;  %v832_v22 = vld [vmem:[#allocation2 + $0x38] sm:$0xff] (%p449_p5) }
 0x24a   : > { %v846_v28 = vadd.f32 %v1071_v1, %v832_v22 }
 0x24d   : > { %874 = vperm.xlu1 %1276, %v822_v60   ;;  %869 = vperm.xlu0 %1275, %v821_v61  }
 0x251   : > { %884 = vperm.xlu1 %1276, %v824_v62   ;;  %879 = vperm.xlu0 %1275, %v823_v63  }
 0x2c4   : > { %v860_v7 = vpop.permute.xlu1 %859  ;;  %v850_v8 = vpop.permute.xlu0 %849 }
 0x2c5   : > { %v889_v9 = vmul.f32 %v860_v7, %v841_v3  ;;  %v887_v10 = vmul.f32 %v850_v8, %v839_v4 }
 0x2c7   : > { %897 = vst [vmem:[%s1415_s11 + $0x10] sm:$0xff] %v889_v9  ;;  %895 = vst [vmem:[%s1415_s11] sm:$0xff] %v887_v10 }
 0x2c8   : > { %v865_v16 = vpop.permute.xlu1 %864  ;;  %v855_v17 = vpop.permute.xlu0 %854 }
 0x2c9   : > { %v890_v18 = vmul.f32 %v865_v16, %v842_v11  ;;  %v888_v19 = vmul.f32 %v855_v17, %v840_v12 }
 0x2cb   : > { %898 = vst [vmem:[%s1415_s11 + $0x18] sm:$0xff] %v890_v18  ;;  %896 = vst [vmem:[%s1415_s11 + $0x8] sm:$0xff] %v888_v19 }
 0x2cc   : > { %v875_v24 = vpop.permute.xlu1 %874  ;;  %v870_v25 = vpop.permute.xlu0 %869 }
 0x2cd   : > { %v892_v26 = vmul.f32 %v875_v24, %v844_v20  ;;  %v891_v27 = vmul.f32 %v870_v25, %v843_v21 }
 0x2cf   : > { %900 = vst [vmem:[%s1415_s11 + $0x28] sm:$0xff] %v892_v26  ;;  %899 = vst [vmem:[%s1415_s11 + $0x20] sm:$0xff] %v891_v27 }
 0x2d0   : > { %v885_v15 = vpop.permute.xlu1 %884  ;;  %v880_v30 = vpop.permute.xlu0 %879 }
 0x2d1   : > { %v894_v31 = vmul.f32 %v885_v15, %v846_v28  ;;  %v893_v32 = vmul.f32 %v880_v30, %v845_v29 }
 0x2d3   : > { %902 = vst [vmem:[%s1415_s11 + $0x38] sm:$0xff] %v894_v31  ;;  %901 = vst [vmem:[%s1415_s11 + $0x30] sm:$0xff] %v893_v32 }
 0x2d4 PF: > { %907 = sbr.rel (!%p1069_p6) target bundleno = 731 (0x2db), region = 64  ;;  %v1330_v33 = vmov (%p1069_p6), 0.0  }
 0x2d5   : > { %908 = vst [vmem:[%s1415_s11] sm:$0xff] (%p1069_p6), %v1330_v33  ;;  %909 = vst [vmem:[%s1415_s11 + $0x8] sm:$0xff] (%p1069_p6), %v1330_v33 }
 0x2d6   : > { %910 = vst [vmem:[%s1415_s11 + $0x10] sm:$0xff] (%p1069_p6), %v1330_v33  ;;  %911 = vst [vmem:[%s1415_s11 + $0x18] sm:$0xff] (%p1069_p6), %v1330_v33 }
 0x2d7   : > { %912 = vst [vmem:[%s1415_s11 + $0x20] sm:$0xff] (%p1069_p6), %v1330_v33  ;;  %913 = vst [vmem:[%s1415_s11 + $0x28] sm:$0xff] (%p1069_p6), %v1330_v33 }
 0x2d8   : > { %914 = vst [vmem:[%s1415_s11 + $0x30] sm:$0xff] (%p1069_p6), %v1330_v33  ;;  %915 = vst [vmem:[%s1415_s11 + $0x38] sm:$0xff] (%p1069_p6), %v1330_v33 }
 0x2db PF: > { %s28_s15 = sadd.s32 1, %s1325_s15   ;;  %s1570_s1 = smov %s1321_s14 }
 0x2dc   : > { %p25_p7 = scmp.ge.s32.totalorder %s28_s15, 11   ;;  %s1571_s14 = smov %s1573_s16 }
 0x2de   :  { %27 = sbr.rel (!%p25_p7) target bundleno = 27 (0x1b), region = 109 }

</bundles_post_ra>
